<compile_context>
chip_gen: v6e
topology: v6e:2x2x1
jax: 0.10.0
libtpu: 0.0.40
codegen_flags: <defaults>
</compile_context>

<pallas_src>
import functools

import jax
import jax.numpy as jnp
import numpy as np
from jax import lax
from jax.experimental import pallas as pl
from jax.experimental.pallas import tpu as pltpu

EPS = 1e-5  # PyTorch GroupNorm default eps


def _gn_silu(z, gamma, beta, sg, bcast):
    """GroupNorm + SiLU on a lane-packed (BT, H, W*C) slab (all f32).

    z:      (BT, H, W*C)  value, lane index = x*C + c
    gamma:  (1, C), beta: (1, C)
    sg:     (W*C, C)  pooling matrix: sg[x*C+c, c'] = 1/(H*W*gs) if group(c)==group(c')
    bcast:  (C, W*C)  broadcast matrix: bcast[c, x*C+c'] = (c == c')
    """
    bt = z.shape[0]
    # ONE reduction pass + ONE stats matmul for both moments (per image).
    zc = jnp.concatenate([z, z * z], axis=0)                    # (2*BT, H, WC)
    s = jnp.sum(zc, axis=1)                                     # (2*BT, WC)
    g = jnp.dot(s, sg, preferred_element_type=jnp.float32)      # (2*BT, C)
    gmean = g[:bt]                                              # (BT, C)
    gex2 = g[bt:]
    gvar = jnp.maximum(gex2 - gmean * gmean, 0.0)               # clamp neg var
    inv = lax.rsqrt(gvar + EPS)
    a_n = gamma * inv                                           # fold affine: y = a*x + b
    b_n = beta - gmean * a_n
    # ONE broadcast matmul for both affine terms.
    ab = jnp.concatenate([a_n, b_n], axis=0)                    # (2*BT, C)
    abw = jnp.dot(ab, bcast, preferred_element_type=jnp.float32)  # (2*BT, WC)
    a_w = abw[:bt][:, None, :]                                  # (BT, 1, WC)
    b_w = abw[bt:][:, None, :]
    y = z * a_w + b_w
    return y * jax.nn.sigmoid(y)                                # SiLU (f32 EUP)


def resblock_kernel(xp_ref, wcat_ref, w2cat_ref, bcat_ref, b2w_ref,
                    g1_ref, be1_ref, g2_ref, be2_ref, sg_ref, bc_ref,
                    o_ref, *, BT, H, W, Cout):
    WC = W * Cout
    BH = BT * H

    # ---- conv1 + 1x1 shortcut: ONE bf16 matmul, M = BT*H, K = 3*W*Cin, N = 2*W*Cout
    xp = xp_ref[...]                                            # (BT, H+2, W*Cin) f32
    x3 = jnp.concatenate([xp[:, 0:H], xp[:, 1:H + 1], xp[:, 2:H + 2]], axis=-1)
    x2 = x3.reshape(BH, x3.shape[-1]).astype(jnp.bfloat16)
    acc = jnp.dot(x2, wcat_ref[...], preferred_element_type=jnp.float32)  # (BH, 2*WC)
    acc = acc + bcat_ref[...]                                   # b1 | bsc folded, one add
    pre1 = acc[:, :WC].reshape(BT, H, WC)                       # conv1 pre-activation
    sc = acc[:, WC:].reshape(BT, H, WC)                         # shortcut output

    # ---- GroupNorm1 + SiLU (per-image stats, stacked-matmul form) ----
    h1 = _gn_silu(pre1, g1_ref[...], be1_ref[...], sg_ref[...], bc_ref[...])

    # ---- conv2: ONE bf16 matmul, K = 3*W*Cout; taps built in-vregs (no scratch) ----
    zrow = jnp.zeros((BT, 1, WC), jnp.float32)
    dn = jnp.concatenate([zrow, h1[:, :H - 1]], axis=1)         # tap ky=0: row y -> h1[y-1]
    up = jnp.concatenate([h1[:, 1:], zrow], axis=1)             # tap ky=2: row y -> h1[y+1]
    cat2 = jnp.concatenate([dn, h1, up], axis=-1)               # (BT, H, 3*WC)
    cat2 = cat2.reshape(BH, 3 * WC).astype(jnp.bfloat16)
    acc2 = jnp.dot(cat2, w2cat_ref[...], preferred_element_type=jnp.float32)
    acc2 = (acc2 + b2w_ref[...]).reshape(BT, H, WC)

    # ---- GroupNorm2 + SiLU + residual; lane-dense (BT, H, 128k) store ----
    # TODO(synk): emit bf16 here if the consumer of this block takes bf16 activations.
    h2 = _gn_silu(acc2, g2_ref[...], be2_ref[...], sg_ref[...], bc_ref[...])
    o_ref[...] = h2 + sc


def _band_matrix(W):
    """band[dx, xin, xo] = 1 iff xin == xo + dx - 1 (width zero-pad folded in)."""
    band = np.zeros((3, W, W), np.float32)
    for dx in range(3):
        for xo in range(W):
            xi = xo + dx - 1
            if 0 <= xi < W:
                band[dx, xi, xo] = 1.0
    return band


def resblock_pallas(x_nchw, params, n_groups):
    B, Cin, H, W = x_nchw.shape
    Cout = params['w1'].shape[-1]
    WCi, WCo = W * Cin, W * Cout
    # Lane-packed layout assumes a lane-dense output row (perf cliff otherwise).
    assert WCo % 128 == 0, "W*Cout must be a multiple of 128 for this packing"

    # Fold as much batch into the MXU M dimension as is MXU-friendly
    # (v5e MXU is 128 rows, v6e/v7x 256).  At test size BT == B -> grid=(1,).
    bt = max(1, min(B, 256 // H))
    while B % bt:
        bt -= 1

    # ---- input: NCHW -> lane-packed rows (B, H, W*Cin), H zero-padded once ----
    x = jnp.transpose(x_nchw, (0, 2, 3, 1)).astype(jnp.float32).reshape(B, H, WCi)
    xp = jnp.pad(x, ((0, 0), (1, 1), (0, 0)))                   # (B, H+2, WCi)

    band = _band_matrix(W)

    # conv1 banded weight (3*W*Cin, W*Cout): width zero-padding folded into the band.
    w1b = jnp.einsum('dio,rdcq->ricoq', band, params['w1']).reshape(3 * WCi, WCo)
    # 1x1 shortcut: block-diagonal weight in the ky=1 (un-shifted) K rows only.
    eye_w = np.eye(W, dtype=np.float32)
    scb = jnp.einsum('io,cq->icoq', eye_w, params['wsc'])       # (W, Cin, W, Cout)
    scb = jnp.stack([jnp.zeros_like(scb), scb, jnp.zeros_like(scb)],
                    axis=0).reshape(3 * WCi, WCo)
    wcat = jnp.concatenate([w1b, scb], axis=1).astype(jnp.bfloat16)  # (3*WCi, 2*WCo)

    # conv2 banded weight, all three row taps fused along K: (3*W*Cout, W*Cout).
    w2cat = jnp.einsum('dio,rdcq->ricoq', band, params['w2']).reshape(3 * WCo, WCo)
    w2cat = w2cat.astype(jnp.bfloat16)

    # Biases broadcast to the wide layout; conv1 + shortcut biases concatenated so
    # the kernel does a single add on the fused accumulator.
    bcat = jnp.concatenate([jnp.tile(params['b1'], (1, W)),
                            jnp.tile(params['bsc'], (1, W))], axis=1)  # (1, 2*WCo)
    b2w = jnp.tile(params['b2'], (1, W))                               # (1, WCo)

    # GroupNorm pooling / broadcast matrices (tiny, 0/1-structured).
    gs = Cout // n_groups
    groups = np.arange(Cout) // gs
    same = (groups[:, None] == groups[None, :]).astype(np.float32) / (H * W * gs)
    sg = jnp.asarray(np.tile(same, (W, 1)))                            # (W*Cout, Cout)
    bcast = jnp.asarray(np.tile(np.eye(Cout, dtype=np.float32), (1, W)))  # (Cout, W*Cout)

    kernel = functools.partial(resblock_kernel, BT=bt, H=H, W=W, Cout=Cout)

    def const(shape):  # grid-constant block (index map independent of the grid step)
        return pl.BlockSpec(shape, lambda g: (0,) * len(shape))

    out = pl.pallas_call(
        kernel,
        out_shape=jax.ShapeDtypeStruct((B, H, WCo), jnp.float32),
        grid_spec=pltpu.PrefetchScalarGridSpec(
            num_scalar_prefetch=0,
            grid=(B // bt,),
            in_specs=[
                pl.BlockSpec((bt, H + 2, WCi), lambda g: (g, 0, 0)),  # padded input (f32)
                const((3 * WCi, 2 * WCo)),   # conv1 + shortcut banded weight (bf16)
                const((3 * WCo, WCo)),       # conv2 banded weight, taps fused on K (bf16)
                const((1, 2 * WCo)),         # b1 | bsc (wide)
                const((1, WCo)),             # b2 (wide)
                const((1, Cout)),            # gamma1
                const((1, Cout)),            # beta1
                const((1, Cout)),            # gamma2
                const((1, Cout)),            # beta2
                const((WCo, Cout)),          # group pooling matrix
                const((Cout, WCo)),          # channel broadcast matrix
            ],
            out_specs=pl.BlockSpec((bt, H, WCo), lambda g: (g, 0, 0)),
        ),
        compiler_params=pltpu.CompilerParams(
            dimension_semantics=("parallel",),
            vmem_limit_bytes=32 * 1024 * 1024),
    )(xp, wcat, w2cat, bcat, b2w,
      params['g1'], params['be1'], params['g2'], params['be2'], sg, bcast)

    out = out.reshape(B, H, W, Cout)
    return jnp.transpose(out, (0, 3, 1, 2))                     # NHWC -> NCHW


def resblock_ref(x_nchw, params, n_groups):
    """Pure-JAX f32 reference matching the PyTorch ResBlock semantics."""
    x = jnp.transpose(x_nchw, (0, 2, 3, 1)).astype(jnp.float32)

    def conv(h, w, b):
        y = lax.conv_general_dilated(
            h, w, (1, 1), 'SAME', dimension_numbers=('NHWC', 'HWIO', 'NHWC'))
        return y + b.reshape(1, 1, 1, -1)

    def gn(h, gamma, beta):
        B, H, W, C = h.shape
        g = h.reshape(B, H, W, n_groups, C // n_groups)
        mean = g.mean(axis=(1, 2, 4), keepdims=True)
        var = ((g - mean) ** 2).mean(axis=(1, 2, 4), keepdims=True)
        gg = (g - mean) / jnp.sqrt(var + EPS)
        return (gg.reshape(B, H, W, C) * gamma.reshape(1, 1, 1, -1)
                + beta.reshape(1, 1, 1, -1))

    silu = lambda t: t * jax.nn.sigmoid(t)
    h = silu(gn(conv(x, params['w1'], params['b1']), params['g1'], params['be1']))
    h = silu(gn(conv(h, params['w2'], params['b2']), params['g2'], params['be2']))
    sc = (jnp.einsum('bhwc,cd->bhwd', x, params['wsc'])
          + params['bsc'].reshape(1, 1, 1, -1))
    return jnp.transpose(h + sc, (0, 3, 1, 2))


if __name__ == "__main__":
    B, Cin, Cout, H, W, n_groups = 2, 4, 8, 16, 16, 8

    key = jax.random.PRNGKey(0)
    keys = jax.random.split(key, 11)
    params = {
        'w1':  0.1 * jax.random.normal(keys[0], (3, 3, Cin, Cout), jnp.float32),
        'b1':  0.1 * jax.random.normal(keys[1], (1, Cout), jnp.float32),
        'g1':  1.0 + 0.1 * jax.random.normal(keys[2], (1, Cout), jnp.float32),
        'be1': 0.1 * jax.random.normal(keys[3], (1, Cout), jnp.float32),
        'w2':  0.1 * jax.random.normal(keys[4], (3, 3, Cout, Cout), jnp.float32),
        'b2':  0.1 * jax.random.normal(keys[5], (1, Cout), jnp.float32),
        'g2':  1.0 + 0.1 * jax.random.normal(keys[6], (1, Cout), jnp.float32),
        'be2': 0.1 * jax.random.normal(keys[7], (1, Cout), jnp.float32),
        'wsc': 0.1 * jax.random.normal(keys[8], (Cin, Cout), jnp.float32),
        'bsc': 0.1 * jax.random.normal(keys[9], (1, Cout), jnp.float32),
    }
    x = jax.random.normal(keys[10], (B, Cin, H, W), jnp.float32)   # NCHW like PyTorch

    y = resblock_pallas(x, params, n_groups)
    y = jax.block_until_ready(y)

    y_ref = resblock_ref(x, params, n_groups)
    # Tolerance sized for bf16 MXU operands (f32 accumulation).
    np.testing.assert_allclose(np.asarray(y), np.asarray(y_ref),
                               atol=2e-2, rtol=2e-2)
    print("KERNEL_OK")
</pallas_src>

<mosaic_0001>
module attributes {stable_mosaic.version = 11 : i64} {
  func.func @resblock_kernel(%arg0: i32, %arg1: memref<2x18x64xf32, #tpu.memory_space<vmem>>, %arg2: memref<192x256xbf16, #tpu.memory_space<vmem>>, %arg3: memref<384x128xbf16, #tpu.memory_space<vmem>>, %arg4: memref<1x256xf32, #tpu.memory_space<vmem>>, %arg5: memref<1x128xf32, #tpu.memory_space<vmem>>, %arg6: memref<1x8xf32, #tpu.memory_space<vmem>>, %arg7: memref<1x8xf32, #tpu.memory_space<vmem>>, %arg8: memref<1x8xf32, #tpu.memory_space<vmem>>, %arg9: memref<1x8xf32, #tpu.memory_space<vmem>>, %arg10: memref<128x8xf32, #tpu.memory_space<vmem>>, %arg11: memref<8x128xf32, #tpu.memory_space<vmem>>, %arg12: memref<2x16x128xf32, #tpu.memory_space<vmem>>) attributes {dimension_semantics = [#tpu.dimension_semantics<parallel>], iteration_bounds = array<i64: 1>, scalar_prefetch = 0 : i64, scratch_operands = 0 : i64, tpu.core_type = #tpu.core_type<tc>, window_params = [{transform_indices = @transform_0, window_bounds = array<i64: 2, 18, 64>}, {pipeline_mode = #tpu.pipeline_mode<synchronous>, transform_indices = @transform_1, window_bounds = array<i64: 192, 256>}, {pipeline_mode = #tpu.pipeline_mode<synchronous>, transform_indices = @transform_2, window_bounds = array<i64: 384, 128>}, {pipeline_mode = #tpu.pipeline_mode<synchronous>, transform_indices = @transform_3, window_bounds = array<i64: 1, 256>}, {pipeline_mode = #tpu.pipeline_mode<synchronous>, transform_indices = @transform_4, window_bounds = array<i64: 1, 128>}, {pipeline_mode = #tpu.pipeline_mode<synchronous>, transform_indices = @transform_5, window_bounds = array<i64: 1, 8>}, {pipeline_mode = #tpu.pipeline_mode<synchronous>, transform_indices = @transform_6, window_bounds = array<i64: 1, 8>}, {pipeline_mode = #tpu.pipeline_mode<synchronous>, transform_indices = @transform_7, window_bounds = array<i64: 1, 8>}, {pipeline_mode = #tpu.pipeline_mode<synchronous>, transform_indices = @transform_8, window_bounds = array<i64: 1, 8>}, {pipeline_mode = #tpu.pipeline_mode<synchronous>, transform_indices = @transform_9, window_bounds = array<i64: 128, 8>}, {pipeline_mode = #tpu.pipeline_mode<synchronous>, transform_indices = @transform_10, window_bounds = array<i64: 8, 128>}, {transform_indices = @transform_11, window_bounds = array<i64: 2, 16, 128>}]} {
    %c0 = arith.constant 0 : index
    %c0_0 = arith.constant 0 : index
    %c0_1 = arith.constant 0 : index
    %0 = vector.load %arg1[%c0, %c0_0, %c0_1] : memref<2x18x64xf32, #tpu.memory_space<vmem>>, vector<2x18x64xf32>
    %1 = vector.extract_strided_slice %0 {offsets = [0, 0, 0], sizes = [2, 16, 64], strides = [1, 1, 1]} : vector<2x18x64xf32> to vector<2x16x64xf32>
    %2 = vector.extract_strided_slice %0 {offsets = [0, 1, 0], sizes = [2, 16, 64], strides = [1, 1, 1]} : vector<2x18x64xf32> to vector<2x16x64xf32>
    %3 = vector.extract_strided_slice %0 {offsets = [0, 2, 0], sizes = [2, 16, 64], strides = [1, 1, 1]} : vector<2x18x64xf32> to vector<2x16x64xf32>
    %4 = tpu.concatenate %1, %2, %3 in 2 : vector<2x16x64xf32>, vector<2x16x64xf32>, vector<2x16x64xf32> -> vector<2x16x192xf32>
    %5 = vector.shape_cast %4 : vector<2x16x192xf32> to vector<32x192xf32>
    %6 = arith.truncf %5 : vector<32x192xf32> to vector<32x192xbf16>
    %c0_2 = arith.constant 0 : index
    %c0_3 = arith.constant 0 : index
    %7 = vector.load %arg2[%c0_2, %c0_3] : memref<192x256xbf16, #tpu.memory_space<vmem>>, vector<192x256xbf16>
    %cst = arith.constant dense<0.000000e+00> : vector<32x256xf32>
    %8 = tpu.matmul %6, %7, %cst {dimension_numbers = #tpu.dot_dimension_numbers<[1], [0], [0], [1], [0, 0, 1, 1], [], []>} : vector<32x192xbf16>, vector<192x256xbf16>, vector<32x256xf32> -> vector<32x256xf32>
    %c0_4 = arith.constant 0 : index
    %c0_5 = arith.constant 0 : index
    %9 = vector.load %arg4[%c0_4, %c0_5] : memref<1x256xf32, #tpu.memory_space<vmem>>, vector<1x256xf32>
    %10 = vector.broadcast %9 : vector<1x256xf32> to vector<32x256xf32>
    %11 = arith.addf %8, %10 : vector<32x256xf32>
    %12 = vector.extract_strided_slice %11 {offsets = [0, 0], sizes = [32, 128], strides = [1, 1]} : vector<32x256xf32> to vector<32x128xf32>
    %13 = vector.shape_cast %12 : vector<32x128xf32> to vector<2x16x128xf32>
    %14 = vector.extract_strided_slice %11 {offsets = [0, 128], sizes = [32, 128], strides = [1, 1]} : vector<32x256xf32> to vector<32x128xf32>
    %15 = vector.shape_cast %14 : vector<32x128xf32> to vector<2x16x128xf32>
    %c0_6 = arith.constant 0 : index
    %c0_7 = arith.constant 0 : index
    %16 = vector.load %arg6[%c0_6, %c0_7] : memref<1x8xf32, #tpu.memory_space<vmem>>, vector<1x8xf32>
    %c0_8 = arith.constant 0 : index
    %c0_9 = arith.constant 0 : index
    %17 = vector.load %arg7[%c0_8, %c0_9] : memref<1x8xf32, #tpu.memory_space<vmem>>, vector<1x8xf32>
    %c0_10 = arith.constant 0 : index
    %c0_11 = arith.constant 0 : index
    %18 = vector.load %arg10[%c0_10, %c0_11] : memref<128x8xf32, #tpu.memory_space<vmem>>, vector<128x8xf32>
    %c0_12 = arith.constant 0 : index
    %c0_13 = arith.constant 0 : index
    %19 = vector.load %arg11[%c0_12, %c0_13] : memref<8x128xf32, #tpu.memory_space<vmem>>, vector<8x128xf32>
    %20 = arith.mulf %13, %13 : vector<2x16x128xf32>
    %21 = tpu.concatenate %13, %20 in 0 : vector<2x16x128xf32>, vector<2x16x128xf32> -> vector<4x16x128xf32>
    %cst_14 = arith.constant dense<0.000000e+00> : vector<4x128xf32>
    %22 = vector.multi_reduction <add>, %21, %cst_14 [1] : vector<4x16x128xf32> to vector<4x128xf32>
    %cst_15 = arith.constant dense<0.000000e+00> : vector<4x8xf32>
    %23 = tpu.matmul %22, %18, %cst_15 {dimension_numbers = #tpu.dot_dimension_numbers<[1], [0], [0], [1], [0, 0, 1, 1], [], []>} : vector<4x128xf32>, vector<128x8xf32>, vector<4x8xf32> -> vector<4x8xf32>
    %24 = vector.extract_strided_slice %23 {offsets = [0, 0], sizes = [2, 8], strides = [1, 1]} : vector<4x8xf32> to vector<2x8xf32>
    %25 = vector.extract_strided_slice %23 {offsets = [2, 0], sizes = [2, 8], strides = [1, 1]} : vector<4x8xf32> to vector<2x8xf32>
    %26 = arith.mulf %24, %24 : vector<2x8xf32>
    %27 = arith.subf %25, %26 : vector<2x8xf32>
    %cst_16 = arith.constant 0.000000e+00 : f32
    %28 = vector.broadcast %cst_16 : f32 to vector<2x8xf32>
    %29 = arith.maximumf %27, %28 : vector<2x8xf32>
    %cst_17 = arith.constant 9.99999974E-6 : f32
    %30 = vector.broadcast %cst_17 : f32 to vector<2x8xf32>
    %31 = arith.addf %29, %30 : vector<2x8xf32>
    %32 = math.rsqrt %31 : vector<2x8xf32>
    %33 = vector.broadcast %16 : vector<1x8xf32> to vector<2x8xf32>
    %34 = arith.mulf %33, %32 : vector<2x8xf32>
    %35 = arith.mulf %24, %34 : vector<2x8xf32>
    %36 = vector.broadcast %17 : vector<1x8xf32> to vector<2x8xf32>
    %37 = arith.subf %36, %35 : vector<2x8xf32>
    %38 = tpu.concatenate %34, %37 in 0 : vector<2x8xf32>, vector<2x8xf32> -> vector<4x8xf32>
    %cst_18 = arith.constant dense<0.000000e+00> : vector<4x128xf32>
    %39 = tpu.matmul %38, %19, %cst_18 {dimension_numbers = #tpu.dot_dimension_numbers<[1], [0], [0], [1], [0, 0, 1, 1], [], []>} : vector<4x8xf32>, vector<8x128xf32>, vector<4x128xf32> -> vector<4x128xf32>
    %40 = vector.extract_strided_slice %39 {offsets = [0, 0], sizes = [2, 128], strides = [1, 1]} : vector<4x128xf32> to vector<2x128xf32>
    %41 = vector.shape_cast %40 : vector<2x128xf32> to vector<2x1x128xf32>
    %42 = vector.extract_strided_slice %39 {offsets = [2, 0], sizes = [2, 128], strides = [1, 1]} : vector<4x128xf32> to vector<2x128xf32>
    %43 = vector.shape_cast %42 : vector<2x128xf32> to vector<2x1x128xf32>
    %44 = vector.broadcast %41 : vector<2x1x128xf32> to vector<2x16x128xf32>
    %45 = arith.mulf %13, %44 : vector<2x16x128xf32>
    %46 = vector.broadcast %43 : vector<2x1x128xf32> to vector<2x16x128xf32>
    %47 = arith.addf %45, %46 : vector<2x16x128xf32>
    %48 = arith.negf %47 : vector<2x16x128xf32>
    %49 = math.exp %48 : vector<2x16x128xf32>
    %cst_19 = arith.constant 1.000000e+00 : f32
    %50 = vector.broadcast %cst_19 : f32 to vector<2x16x128xf32>
    %51 = arith.addf %50, %49 : vector<2x16x128xf32>
    %52 = arith.divf %50, %51 : vector<2x16x128xf32>
    %53 = arith.mulf %47, %52 : vector<2x16x128xf32>
    %cst_20 = arith.constant 0.000000e+00 : f32
    %54 = vector.broadcast %cst_20 : f32 to vector<2x1x128xf32>
    %55 = vector.extract_strided_slice %53 {offsets = [0, 0, 0], sizes = [2, 15, 128], strides = [1, 1, 1]} : vector<2x16x128xf32> to vector<2x15x128xf32>
    %56 = tpu.concatenate %54, %55 in 1 : vector<2x1x128xf32>, vector<2x15x128xf32> -> vector<2x16x128xf32>
    %57 = vector.extract_strided_slice %53 {offsets = [0, 1, 0], sizes = [2, 15, 128], strides = [1, 1, 1]} : vector<2x16x128xf32> to vector<2x15x128xf32>
    %58 = tpu.concatenate %57, %54 in 1 : vector<2x15x128xf32>, vector<2x1x128xf32> -> vector<2x16x128xf32>
    %59 = tpu.concatenate %56, %53, %58 in 2 : vector<2x16x128xf32>, vector<2x16x128xf32>, vector<2x16x128xf32> -> vector<2x16x384xf32>
    %60 = vector.shape_cast %59 : vector<2x16x384xf32> to vector<32x384xf32>
    %61 = arith.truncf %60 : vector<32x384xf32> to vector<32x384xbf16>
    %c0_21 = arith.constant 0 : index
    %c0_22 = arith.constant 0 : index
    %62 = vector.load %arg3[%c0_21, %c0_22] : memref<384x128xbf16, #tpu.memory_space<vmem>>, vector<384x128xbf16>
    %cst_23 = arith.constant dense<0.000000e+00> : vector<32x128xf32>
    %63 = tpu.matmul %61, %62, %cst_23 {dimension_numbers = #tpu.dot_dimension_numbers<[1], [0], [0], [1], [0, 0, 1, 1], [], []>} : vector<32x384xbf16>, vector<384x128xbf16>, vector<32x128xf32> -> vector<32x128xf32>
    %c0_24 = arith.constant 0 : index
    %c0_25 = arith.constant 0 : index
    %64 = vector.load %arg5[%c0_24, %c0_25] : memref<1x128xf32, #tpu.memory_space<vmem>>, vector<1x128xf32>
    %65 = vector.broadcast %64 : vector<1x128xf32> to vector<32x128xf32>
    %66 = arith.addf %63, %65 : vector<32x128xf32>
    %67 = vector.shape_cast %66 : vector<32x128xf32> to vector<2x16x128xf32>
    %c0_26 = arith.constant 0 : index
    %c0_27 = arith.constant 0 : index
    %68 = vector.load %arg8[%c0_26, %c0_27] : memref<1x8xf32, #tpu.memory_space<vmem>>, vector<1x8xf32>
    %c0_28 = arith.constant 0 : index
    %c0_29 = arith.constant 0 : index
    %69 = vector.load %arg9[%c0_28, %c0_29] : memref<1x8xf32, #tpu.memory_space<vmem>>, vector<1x8xf32>
    %c0_30 = arith.constant 0 : index
    %c0_31 = arith.constant 0 : index
    %70 = vector.load %arg10[%c0_30, %c0_31] : memref<128x8xf32, #tpu.memory_space<vmem>>, vector<128x8xf32>
    %c0_32 = arith.constant 0 : index
    %c0_33 = arith.constant 0 : index
    %71 = vector.load %arg11[%c0_32, %c0_33] : memref<8x128xf32, #tpu.memory_space<vmem>>, vector<8x128xf32>
    %72 = arith.mulf %67, %67 : vector<2x16x128xf32>
    %73 = tpu.concatenate %67, %72 in 0 : vector<2x16x128xf32>, vector<2x16x128xf32> -> vector<4x16x128xf32>
    %cst_34 = arith.constant dense<0.000000e+00> : vector<4x128xf32>
    %74 = vector.multi_reduction <add>, %73, %cst_34 [1] : vector<4x16x128xf32> to vector<4x128xf32>
    %cst_35 = arith.constant dense<0.000000e+00> : vector<4x8xf32>
    %75 = tpu.matmul %74, %70, %cst_35 {dimension_numbers = #tpu.dot_dimension_numbers<[1], [0], [0], [1], [0, 0, 1, 1], [], []>} : vector<4x128xf32>, vector<128x8xf32>, vector<4x8xf32> -> vector<4x8xf32>
    %76 = vector.extract_strided_slice %75 {offsets = [0, 0], sizes = [2, 8], strides = [1, 1]} : vector<4x8xf32> to vector<2x8xf32>
    %77 = vector.extract_strided_slice %75 {offsets = [2, 0], sizes = [2, 8], strides = [1, 1]} : vector<4x8xf32> to vector<2x8xf32>
    %78 = arith.mulf %76, %76 : vector<2x8xf32>
    %79 = arith.subf %77, %78 : vector<2x8xf32>
    %cst_36 = arith.constant 0.000000e+00 : f32
    %80 = vector.broadcast %cst_36 : f32 to vector<2x8xf32>
    %81 = arith.maximumf %79, %80 : vector<2x8xf32>
    %cst_37 = arith.constant 9.99999974E-6 : f32
    %82 = vector.broadcast %cst_37 : f32 to vector<2x8xf32>
    %83 = arith.addf %81, %82 : vector<2x8xf32>
    %84 = math.rsqrt %83 : vector<2x8xf32>
    %85 = vector.broadcast %68 : vector<1x8xf32> to vector<2x8xf32>
    %86 = arith.mulf %85, %84 : vector<2x8xf32>
    %87 = arith.mulf %76, %86 : vector<2x8xf32>
    %88 = vector.broadcast %69 : vector<1x8xf32> to vector<2x8xf32>
    %89 = arith.subf %88, %87 : vector<2x8xf32>
    %90 = tpu.concatenate %86, %89 in 0 : vector<2x8xf32>, vector<2x8xf32> -> vector<4x8xf32>
    %cst_38 = arith.constant dense<0.000000e+00> : vector<4x128xf32>
    %91 = tpu.matmul %90, %71, %cst_38 {dimension_numbers = #tpu.dot_dimension_numbers<[1], [0], [0], [1], [0, 0, 1, 1], [], []>} : vector<4x8xf32>, vector<8x128xf32>, vector<4x128xf32> -> vector<4x128xf32>
    %92 = vector.extract_strided_slice %91 {offsets = [0, 0], sizes = [2, 128], strides = [1, 1]} : vector<4x128xf32> to vector<2x128xf32>
    %93 = vector.shape_cast %92 : vector<2x128xf32> to vector<2x1x128xf32>
    %94 = vector.extract_strided_slice %91 {offsets = [2, 0], sizes = [2, 128], strides = [1, 1]} : vector<4x128xf32> to vector<2x128xf32>
    %95 = vector.shape_cast %94 : vector<2x128xf32> to vector<2x1x128xf32>
    %96 = vector.broadcast %93 : vector<2x1x128xf32> to vector<2x16x128xf32>
    %97 = arith.mulf %67, %96 : vector<2x16x128xf32>
    %98 = vector.broadcast %95 : vector<2x1x128xf32> to vector<2x16x128xf32>
    %99 = arith.addf %97, %98 : vector<2x16x128xf32>
    %100 = arith.negf %99 : vector<2x16x128xf32>
    %101 = math.exp %100 : vector<2x16x128xf32>
    %cst_39 = arith.constant 1.000000e+00 : f32
    %102 = vector.broadcast %cst_39 : f32 to vector<2x16x128xf32>
    %103 = arith.addf %102, %101 : vector<2x16x128xf32>
    %104 = arith.divf %102, %103 : vector<2x16x128xf32>
    %105 = arith.mulf %99, %104 : vector<2x16x128xf32>
    %106 = arith.addf %105, %15 : vector<2x16x128xf32>
    %c0_40 = arith.constant 0 : index
    %c0_41 = arith.constant 0 : index
    %c0_42 = arith.constant 0 : index
    %107 = vector.load %arg12[%c0_40, %c0_41, %c0_42] : memref<2x16x128xf32, #tpu.memory_space<vmem>>, vector<2x16x128xf32>
    tpu.vector_store %arg12[%c0_40, %c0_41, %c0_42], %106 {strides = array<i32>} : memref<2x16x128xf32, #tpu.memory_space<vmem>>, vector<2x16x128xf32>,
    return
  }
  func.func @transform_0(%arg0: i32) -> (i32, i32, i32) {
    %c0_i32 = arith.constant 0 : i32
    %c0_i32_0 = arith.constant 0 : i32
    %c0_i32_1 = arith.constant 0 : i32
    return %arg0, %c0_i32, %c0_i32_0 : i32, i32, i32
  }
  func.func @transform_1(%arg0: i32) -> (i32, i32) {
    %c0_i32 = arith.constant 0 : i32
    %c0_i32_0 = arith.constant 0 : i32
    %c0_i32_1 = arith.constant 0 : i32
    return %c0_i32, %c0_i32_0 : i32, i32
  }
  func.func @transform_2(%arg0: i32) -> (i32, i32) {
    %c0_i32 = arith.constant 0 : i32
    %c0_i32_0 = arith.constant 0 : i32
    %c0_i32_1 = arith.constant 0 : i32
    return %c0_i32, %c0_i32_0 : i32, i32
  }
  func.func @transform_3(%arg0: i32) -> (i32, i32) {
    %c0_i32 = arith.constant 0 : i32
    %c0_i32_0 = arith.constant 0 : i32
    %c0_i32_1 = arith.constant 0 : i32
    return %c0_i32, %c0_i32_0 : i32, i32
  }
  func.func @transform_4(%arg0: i32) -> (i32, i32) {
    %c0_i32 = arith.constant 0 : i32
    %c0_i32_0 = arith.constant 0 : i32
    %c0_i32_1 = arith.constant 0 : i32
    return %c0_i32, %c0_i32_0 : i32, i32
  }
  func.func @transform_5(%arg0: i32) -> (i32, i32) {
    %c0_i32 = arith.constant 0 : i32
    %c0_i32_0 = arith.constant 0 : i32
    %c0_i32_1 = arith.constant 0 : i32
    return %c0_i32, %c0_i32_0 : i32, i32
  }
  func.func @transform_6(%arg0: i32) -> (i32, i32) {
    %c0_i32 = arith.constant 0 : i32
    %c0_i32_0 = arith.constant 0 : i32
    %c0_i32_1 = arith.constant 0 : i32
    return %c0_i32, %c0_i32_0 : i32, i32
  }
  func.func @transform_7(%arg0: i32) -> (i32, i32) {
    %c0_i32 = arith.constant 0 : i32
    %c0_i32_0 = arith.constant 0 : i32
    %c0_i32_1 = arith.constant 0 : i32
    return %c0_i32, %c0_i32_0 : i32, i32
  }
  func.func @transform_8(%arg0: i32) -> (i32, i32) {
    %c0_i32 = arith.constant 0 : i32
    %c0_i32_0 = arith.constant 0 : i32
    %c0_i32_1 = arith.constant 0 : i32
    return %c0_i32, %c0_i32_0 : i32, i32
  }
  func.func @transform_9(%arg0: i32) -> (i32, i32) {
    %c0_i32 = arith.constant 0 : i32
    %c0_i32_0 = arith.constant 0 : i32
    %c0_i32_1 = arith.constant 0 : i32
    return %c0_i32, %c0_i32_0 : i32, i32
  }
  func.func @transform_10(%arg0: i32) -> (i32, i32) {
    %c0_i32 = arith.constant 0 : i32
    %c0_i32_0 = arith.constant 0 : i32
    %c0_i32_1 = arith.constant 0 : i32
    return %c0_i32, %c0_i32_0 : i32, i32
  }
  func.func @transform_11(%arg0: i32) -> (i32, i32, i32) {
    %c0_i32 = arith.constant 0 : i32
    %c0_i32_0 = arith.constant 0 : i32
    %c0_i32_1 = arith.constant 0 : i32
    return %arg0, %c0_i32, %c0_i32_0 : i32, i32, i32
  }
}

</mosaic_0001>

<bundles_post_ra>
// kernel: tpu_custom_call.1
= control target key start
LH: loop header
LB: loop body
LE: loop exit
PB: predicated region body
PF: predicated region fallthrough
CT: control target
= control target key end

     0   :  { %16 = vsyncpa [#allocation3], 0  ;;  %s2209_s0 = inlined_call_operand.vmem [shape: f32[2,18,64], index: 0, kind: input, shape index: {}]   ;;  %s2210_s1 = inlined_call_operand.vmem [shape: bf16[192,256], index: 1, kind: input, shape index: {}]   ;;  %s2211_s2 = inlined_call_operand.hbm [shape: bf16[384,128], index: 2, kind: input, shape index: {}]   ;;  %s2212_s3 = inlined_call_operand.vmem [shape: f32[1,256], index: 3, kind: input, shape index: {}]   ;;  %s2213_s4 = inlined_call_operand.vmem [shape: f32[1,128], index: 4, kind: input, shape index: {}]   ;;  %s2214_s5 = inlined_call_operand.vmem [shape: f32[1,8], index: 5, kind: input, shape index: {}]   ;;  %s2215_s6 = inlined_call_operand.vmem [shape: f32[1,8], index: 6, kind: input, shape index: {}]   ;;  %s2216_s7 = inlined_call_operand.vmem [shape: f32[1,8], index: 7, kind: input, shape index: {}]   ;;  %s2217_s8 = inlined_call_operand.vmem [shape: f32[1,8], index: 8, kind: input, shape index: {}]   ;;  %s2218_s9 = inlined_call_operand.vmem [shape: f32[128,8], index: 9, kind: input, shape index: {}]   ;;  %s2219_s10 = inlined_call_operand.vmem [shape: f32[8,128], index: 10, kind: input, shape index: {}]   ;;  %s2220_s11 = inlined_call_operand.hbm [shape: f32[2,16,128], index: 11, kind: output, shape index: {}]  }
   0x1   :  { %17 = vsyncpa [#allocation4], 0  ;;  %s1714_s17 = smov [#allocation2]  }
   0x2   :  { %s27_s18 = sshll.u32 %s1714_s17, 4  ;;  %s28_s18 = int_to_ptr.vmem [resolvable:$true] %s27_s18 }
   0x3   :  { %s1678_s19 = scalar_lea.vmem %s28_s18, 3072  ;;  %p1683_p1 = scmp.lt.s32.totalorder %s28_s18, %s28_s18 }
   0x4   :  { %p1679_p0 = scmp.ne.s32.totalorder %s28_s18, %s1678_s19  ;;  %p1684_p2 = scmp.lt.s32.totalorder %s1678_s19, %s1678_s19 }
   0x6   :  { %p1685_p3 = por %p1684_p2, %p1683_p1 }
   0x8   :  { %p1686_p4 = pnand %p1685_p3, %p1679_p0 }
   0xa   :  { %1689 = shalt.err (!%p1686_p4)
}
   0xb   :  { %s1715_s20 = smov 64   ;;  %s1716_s21 = smov 4  }
   0xc   :  { %33 = dma.hbm_to_vmem [thread:$0]  %s2211_s2, 3072, %s28_s18, [#allocation3], %s1715_s20, %s1715_s20, %s1716_s21  }
   0xd   :  { %1710 = dma.done.wait [#allocation3], 3072  }
   0xe   :  { %1711 = vsyncadd [#allocation3], 4294964224  ;;  %v1792_v0 = vld [vmem:[%s2209_s0] sm:$0xff]  ;;  %v1797_v1 = vld [vmem:[%s2209_s0 + $0x8] sm:$0xff]  ;;  %vm66_vm0 = vcmask 1046528   ;;  %vm89_vm1 = vcmask 1045504  }
   0xf   :  { %v56_v2 = vld [vmem:[%s2209_s0 + $0x10] sm:$0x3]  ;;  %v67_v3 = vrot.slane %v1792_v0, 1  ;;  %v68_v4 = vrot.slane %v1797_v1, 1  ;;  %v1807_v6 = vld [vmem:[%s2209_s0 + $0x18] sm:$0xff]  ;;  %v1812_v7 = vld [vmem:[%s2209_s0 + $0x20] sm:$0xff] }
  0x10   :  { %v70_v5 = vrot.slane %v56_v2, 1  ;;  %v59_v8 = vld [vmem:[%s2209_s0 + $0x28] sm:$0x3]  ;;  %v72_v9 = vrot.slane %v1807_v6, 1  ;;  %v73_v10 = vrot.slane %v1812_v7, 1  ;;  %v95_v11 = vrot.slane %v1807_v6, 2 }
  0x11   :  { %v96_v12 = vrot.slane %v1812_v7, 2  ;;  %v69_v13 = vsel %vm66_vm0, %v67_v3, %v68_v4  ;;  %v75_v15 = vrot.slane %v59_v8, 1  ;;  %v98_v16 = vrot.slane %v59_v8, 2  ;;  %v1574_v17 = vld [vmem:[%s2210_s1 + $0x74] ss:$8 sps:$4 sm:$0xff]  }
  0x12   :  { %v71_v14 = vsel %vm66_vm0, %v68_v4, %v70_v5  ;;  %v74_v19 = vsel %vm66_vm0, %v72_v9, %v73_v10  ;;  %v1576_v20 = vld [vmem:[%s2210_s1 + $0x70] ss:$8 sps:$4 sm:$0xff]   ;;  %v1577_v21 = vld [vmem:[%s2210_s1 + $0x64] ss:$8 sps:$4 sm:$0xff]   ;;  %v90_v22 = vrot.slane %v1792_v0, 2  ;;  %275 = vmatprep.subr.bf16.mxu0 %v1574_v17  ;;  %v91_v25 = vrot.slane %v1797_v1, 2 }
  0x13   :  { %v1564_v18 = vpack.i.bf16 %v71_v14, %v69_v13  ;;  %v1835_v23 = vsel %vm89_vm1, %v95_v11, %v96_v12  ;;  %v76_v24 = vsel %vm66_vm0, %v73_v10, %v75_v15  ;;  %v93_v26 = vrot.slane %v56_v2, 2  ;;  %276 = vmatpush1.bf16.msra.mxu0 %v1576_v20  ;;  %v1579_v29 = vld [vmem:[%s2210_s1 + $0x60] ss:$8 sps:$4 sm:$0xff]   ;;  %v1580_v31 = vld [vmem:[%s2210_s1 + $0x54] ss:$8 sps:$4 sm:$0xff]  }
  0x14   :  { %v1840_v27 = vsel %vm89_vm1, %v96_v12, %v98_v16  ;;  %v1569_v28 = vpack.i.bf16 %v76_v24, %v74_v19  ;;  %277 = vmatprep.subr.bf16.mxu0 %v1577_v21  ;;  %v92_v32 = vsel %vm89_vm1, %v90_v22, %v91_v25  ;;  %v1582_v35 = vld [vmem:[%s2210_s1 + $0x50] ss:$8 sps:$4 sm:$0xff]   ;;  %vm104_vm2 = vcmask 523264   ;;  %v1583_v36 = vld [vmem:[%s2210_s1 + $0x44] ss:$8 sps:$4 sm:$0xff]  }
  0x15   :  { %1565 = vrot.lane.b32.xlu0 %v1564_v18, %s1715_s20  ;;  %v112_v30 = vpack.c.bf16 %v1840_v27, %v1835_v23  ;;  %v94_v33 = vsel %vm89_vm1, %v91_v25, %v93_v26  ;;  %v1585_v37 = vld [vmem:[%s2210_s1 + $0x40] ss:$8 sps:$4 sm:$0xff]   ;;  %v1586_v38 = vld [vmem:[%s2210_s1 + $0x34] ss:$8 sps:$4 sm:$0xff]   ;;  %v1588_v39 = vld [vmem:[%s2210_s1 + $0x30] ss:$8 sps:$4 sm:$0xff]   ;;  %v139_v19 = vlaneseq }
  0x16   :  { %v110_v34 = vpack.c.bf16 %v94_v33, %v92_v32  ;;  %v1589_v40 = vld [vmem:[%s2210_s1 + $0x24] ss:$8 sps:$4 sm:$0xff]   ;;  %v1591_v41 = vld [vmem:[%s2210_s1 + $0x20] ss:$8 sps:$4 sm:$0xff]   ;;  %v1592_v42 = vld [vmem:[%s2210_s1 + $0x14] ss:$8 sps:$4 sm:$0xff]  }
  0x17   :  { %278 = vmatpush1.bf16.msra.mxu0 %v1579_v29  ;;  %v1594_v43 = vld [vmem:[%s2210_s1 + $0x10] ss:$8 sps:$4 sm:$0xff]   ;;  %v1595_v44 = vld [vmem:[%s2210_s1 + $0x4] ss:$8 sps:$4 sm:$0xff]   ;;  %v1597_v45 = vld [vmem:[%s2210_s1] ss:$8 sps:$4 sm:$0xff]  }
  0x18   :  { %279 = vmatprep.subr.bf16.mxu0 %v1580_v31  ;;  %1323 = vmatprep.mubr.msk.bf16.mxu0 %vm104_vm2, %v110_v34  ;;  %v1598_v46 = vld [vmem:[%s2210_s1 + $0xb4] ss:$8 sps:$4 sm:$0xff]   ;;  %v1600_v47 = vld [vmem:[%s2210_s1 + $0xb0] ss:$8 sps:$4 sm:$0xff]   ;;  %v1601_v48 = vld [vmem:[%s2210_s1 + $0xa4] ss:$8 sps:$4 sm:$0xff]  }
  0x19   :  { %1570 = vrot.lane.b32.xlu0 %v1569_v28, %s1715_s20  ;;  %v1603_v49 = vld [vmem:[%s2210_s1 + $0xa0] ss:$8 sps:$4 sm:$0xff]   ;;  %v1604_v50 = vld [vmem:[%s2210_s1 + $0x94] ss:$8 sps:$4 sm:$0xff]   ;;  %v1606_v51 = vld [vmem:[%s2210_s1 + $0x90] ss:$8 sps:$4 sm:$0xff]  }
  0x1a   :  { %v1607_v52 = vld [vmem:[%s2210_s1 + $0x84] ss:$8 sps:$4 sm:$0xff]   ;;  %v1609_v53 = vld [vmem:[%s2210_s1 + $0x80] ss:$8 sps:$4 sm:$0xff]   ;;  %v1717_v4 = vmov 0.0   ;;  %v1960_v8 = vld [vmem:[%s2218_s9 + $0x50] sm:$0xff] }
  0x1b   :  { %280 = vmatpush1.bf16.msra.mxu0 %v1582_v35  ;;  %1454 = vmatprep.subr.mxu1 %v1717_v4  ;;  %v1939_v5 = vld [vmem:[%s2218_s9 + $0x68] sm:$0xff]  ;;  %v1974_v10 = vld [vmem:[%s2218_s9 + $0x40] sm:$0xff]  ;;  %v1981_v11 = vld [vmem:[%s2218_s9 + $0x38] sm:$0xff]  ;;  %vm1718_vm3 = vmmov 0   ;;  %v2036_v20 = vshrl.u32 %v139_v19, 7  ;;  %vm383_vm4 = vcmask 1041409  }
  0x1c   :  { %281 = vmatprep.subr.bf16.mxu0 %v1583_v36  ;;  %v1967_v9 = vld [vmem:[%s2218_s9 + $0x48] sm:$0xff]  ;;  %v1988_v12 = vld [vmem:[%s2218_s9 + $0x30] sm:$0xff]  ;;  %v2002_v14 = vld [vmem:[%s2218_s9 + $0x20] sm:$0xff]  ;;  %1486 = vmatprep.mubr.msk.f32.mxu1 %vm1718_vm3, %v1717_v4  ;;  %vm385_vm5 = vcmask 1042434   ;;  %vm387_vm6 = vcmask 1043459   ;;  %vm489_vm7 = vcmask 1041408  }
  0x1d   :  { %v1995_v13 = vld [vmem:[%s2218_s9 + $0x28] sm:$0xff]  ;;  %v2009_v15 = vld [vmem:[%s2218_s9 + $0x18] sm:$0xff]  ;;  %v2014_v16 = vld [vmem:[%s2218_s9 + $0x10] sm:$0xff]  ;;  %v2039_v21 = vsub.s32 0, %v2036_v20  ;;  %vm491_vm8 = vcmask 64512   ;;  %vm650_vm9 = vcmask 1040384  }
  0x1e   :  { %v2023_v17 = vld [vmem:[%s2218_s9 + $0x8] sm:$0xff]  ;;  %v2030_v18 = vld [vmem:[%s2218_s9] sm:$0xff]  ;;  %vm1357_vm10 = vmneg %vm650_vm9  ;;  %vm1720_vm11 = vmmov 1  }
  0x1f   :  { %282 = vmatpush1.bf16.msra.mxu0 %v1585_v37  ;;  %v2044_v22 = vld [vmem:[%s2212_s3] sm:$0x3]  ;;  %vm2110_vm12 = vmpackc.low %vm1720_vm11, %vm1357_vm10 }
  0x20   :  { %283 = vmatprep.subr.bf16.mxu0 %v1586_v38  ;;  %v142_v23 = vrot.slane %v2044_v22, %v2039_v21  ;;  %vm1365_vm13 = vmpackc.low %vm66_vm0, %vm1720_vm11 }
  0x23   :  { %284 = vmatpush1.bf16.msra.mxu0 %v1588_v39 }
  0x24   :  { %285 = vmatprep.subr.bf16.mxu0 %v1589_v40 }
  0x27   :  { %286 = vmatpush1.bf16.msra.mxu0 %v1591_v41 }
  0x28   :  { %287 = vmatprep.subr.bf16.mxu0 %v1592_v42 }
  0x2b   :  { %288 = vmatpush1.bf16.msra.mxu0 %v1594_v43 }
  0x2c   :  { %289 = vmatprep.subr.bf16.mxu0 %v1595_v44 }
  0x2f   :  { %290 = vmatpush1.bf16.msra.mxu0 %v1597_v45 }
  0x30   :  { %299 = vmatprep.subr.bf16.mxu0 %v1598_v46 }
  0x33   :  { %300 = vmatpush2.bf16.msra.mxu0 %v1600_v47 }
  0x34   :  { %301 = vmatprep.subr.bf16.mxu0 %v1601_v48 }
  0x37   :  { %302 = vmatpush2.bf16.msra.mxu0 %v1603_v49 }
  0x38   :  { %303 = vmatprep.subr.bf16.mxu0 %v1604_v50 }
  0x3b   :  { %304 = vmatpush2.bf16.msra.mxu0 %v1606_v51 }
  0x3c   :  { %305 = vmatprep.subr.bf16.mxu0 %v1607_v52 }
  0x3f   :  { %306 = vmatpush2.bf16.msra.mxu0 %v1609_v53 }
  0x87   :  { %v1566_v54 = vpop.permute.xlu0 %1565 }
  0x88   :  { %v1568_v55 = vunpack.i.h.bf16 %v1566_v54  ;;  %v1567_v56 = vunpack.i.l.bf16 %v1566_v54 }
  0x8a   :  { %v105_v57 = vsel %vm104_vm2, %v1792_v0, %v1567_v56  ;;  %v106_v58 = vsel %vm104_vm2, %v1797_v1, %v1568_v55  ;;  %v1925_v0 = vld [vmem:[%s2218_s9 + $0x78] sm:$0xff]  ;;  %v1932_v1 = vld [vmem:[%s2218_s9 + $0x70] sm:$0xff] }
  0x8b   :  { %v109_v59 = vpack.c.bf16 %v106_v58, %v105_v57  ;;  %v1571_v60 = vpop.permute.xlu0 %1570  ;;  %1455 = vmatpush3.msra.mxu1 %v1925_v0 }
  0x8c   :  { %v1573_v61 = vunpack.i.h.bf16 %v1571_v60  ;;  %v1572_v62 = vunpack.i.l.bf16 %v1571_v60  ;;  %1456 = vmatprep.subr.mxu1 %v1717_v4 }
  0x8d   :  { %308 = vmatmul.mubr.bf16.vlgmr.msra.gmra.mxu0 %v109_v59  ;;  %1457 = vmatpush3.msra.mxu1 %v1932_v1 }
  0x8e   :  { %1324 = vmatprep.mubr.msk.bf16.mxu0 %vm104_vm2, %v112_v30  ;;  %v107_v63 = vsel %vm104_vm2, %v1807_v6, %v1572_v62  ;;  %v108_v2 = vsel %vm104_vm2, %v1812_v7, %v1573_v61  ;;  %1458 = vmatprep.subr.mxu1 %v1717_v4  ;;  %v1946_v6 = vld [vmem:[%s2218_s9 + $0x60] sm:$0xff]  ;;  %v1953_v7 = vld [vmem:[%s2218_s9 + $0x58] sm:$0xff] }
  0x8f   :  { %v111_v3 = vpack.c.bf16 %v108_v2, %v107_v63  ;;  %1459 = vmatpush3.msra.mxu1 %v1939_v5 }
  0x90   :  { %1460 = vmatprep.subr.mxu1 %v1717_v4 }
  0x91   :  { %1461 = vmatpush3.msra.mxu1 %v1946_v6 }
  0x92   :  { %1462 = vmatprep.subr.mxu1 %v1717_v4 }
  0x93   :  { %1463 = vmatpush3.msra.mxu1 %v1953_v7 }
  0x94   :  { %1464 = vmatprep.subr.mxu1 %v1717_v4 }
  0x95   :  { %318 = vmatmul.mubr.bf16.gmra.mxu0 %v111_v3  ;;  %1465 = vmatpush3.msra.mxu1 %v1960_v8 }
  0x96   :  { %1466 = vmatprep.subr.mxu1 %v1717_v4 }
  0x97   :  { %1467 = vmatpush3.msra.mxu1 %v1967_v9 }
  0x98   :  { %1468 = vmatprep.subr.mxu1 %v1717_v4 }
  0x99   :  { %1469 = vmatpush3.msra.mxu1 %v1974_v10 }
  0x9a   :  { %1470 = vmatprep.subr.mxu1 %v1717_v4 }
  0x9b   :  { %1471 = vmatpush3.msra.mxu1 %v1981_v11 }
  0x9c   :  { %1472 = vmatprep.subr.mxu1 %v1717_v4 }
  0x9d   :  { %1473 = vmatpush3.msra.mxu1 %v1988_v12 }
  0x9e   :  { %1474 = vmatprep.subr.mxu1 %v1717_v4 }
  0x9f   :  { %1475 = vmatpush3.msra.mxu1 %v1995_v13 }
  0xa0   :  { %1476 = vmatprep.subr.mxu1 %v1717_v4 }
  0xa1   :  { %1477 = vmatpush3.msra.mxu1 %v2002_v14 }
  0xa2   :  { %1478 = vmatprep.subr.mxu1 %v1717_v4 }
  0xa3   :  { %1479 = vmatpush3.msra.mxu1 %v2009_v15 }
  0xa4   :  { %1480 = vmatprep.subr.mxu1 %v1717_v4 }
  0xa5   :  { %1481 = vmatpush3.msra.mxu1 %v2014_v16 }
  0xa6   :  { %1482 = vmatprep.subr.mxu1 %v1717_v4 }
  0xa7   :  { %1483 = vmatpush3.msra.mxu1 %v2023_v17 }
  0xa8   :  { %1484 = vmatprep.subr.mxu1 %v1717_v4 }
  0xa9   :  { %1485 = vmatpush3.msra.mxu1 %v2030_v18 }
  0xaa   :  { %1489 = vmatprep.subr.mxu1 %v1717_v4 }
 0x14d   :  { %v309_v24 = vpop.f32.mrf.mxu0 }
 0x14e   :  { %v2050_v26 = vadd.f32 %v309_v24, %v142_v23 }
 0x14f   :  { %v2048_v25 = vpop.f32.mrf.mxu0 }
 0x150   :  { %v347_v30 = vmul.f32 %v2050_v26, %v2050_v26 }
 0x151   :  { %v313_v27 = vpop.f32.mrf.mxu0 }
 0x152   :  { %v2052_v28 = vadd.f32 %v313_v27, %v142_v23 }
 0x153   :  { %v2054_v29 = vpop.f32.mrf.mxu0 }
 0x154   :  { %v348_v31 = vmul.f32 %v2052_v28, %v2052_v28  ;;  %v351_v32 = vadd.f32 %v2052_v28, %v2050_v26 }
 0x155   :  { %v319_v33 = vpop.f32.mrf.mxu0 }
 0x156   :  { %v352_v34 = vrot.slane %v351_v32, 4  ;;  %v365_v35 = vadd.f32 %v348_v31, %v347_v30  ;;  %v2064_v39 = vadd.f32 %v319_v33, %v142_v23  ;;  %v2082_v30 = vld [vmem:[%s2219_s10] sm:$0xff] }
 0x157   :  { %v2062_v36 = vpop.f32.mrf.mxu0 }
 0x158   :  { %v353_v37 = vadd.f32 %v352_v34, %v351_v32  ;;  %v366_v38 = vrot.slane %v365_v35, 4  ;;  %v349_v44 = vmul.f32 %v2064_v39, %v2064_v39 }
 0x159   :  { %v323_v40 = vpop.f32.mrf.mxu0 }
 0x15a   :  { %v367_v41 = vadd.f32 %v366_v38, %v365_v35  ;;  %v2066_v42 = vadd.f32 %v323_v40, %v142_v23  ;;  %v354_v43 = vrot.slane %v353_v37, 2  ;;  %v1325_v40 = vld [vmem:[%s2214_s5] ss:$0 sm:$0xff] }
 0x15c   :  { %v350_v45 = vmul.f32 %v2066_v42, %v2066_v42  ;;  %v358_v46 = vadd.f32 %v2066_v42, %v2064_v39  ;;  %v368_v47 = vrot.slane %v367_v41, 2  ;;  %v355_v50 = vadd.f32 %v354_v43, %v353_v37 }
 0x15e   :  { %v359_v48 = vrot.slane %v358_v46, 4  ;;  %v372_v49 = vadd.f32 %v350_v45, %v349_v44  ;;  %v369_v53 = vadd.f32 %v368_v47, %v367_v41  ;;  %v356_v56 = vrot.slane %v355_v50, 1  ;;  %v1326_v45 = vld [vmem:[%s2215_s6] ss:$0 sm:$0xff] }
 0x160   :  { %v360_v51 = vadd.f32 %v359_v48, %v358_v46  ;;  %v373_v52 = vrot.slane %v372_v49, 4  ;;  %v370_v59 = vrot.slane %v369_v53, 1  ;;  %v357_v62 = vadd.f32 %v356_v56, %v355_v50  ;;  %v1610_v50 = vld [vmem:[#allocation2 + $0x78] sm:$0xff]   ;;  %v1616_v56 = vld [vmem:[#allocation2 + $0x68] sm:$0xff]  }
 0x162   :  { %v361_v54 = vrot.slane %v360_v51, 2  ;;  %v374_v55 = vadd.f32 %v373_v52, %v372_v49  ;;  %v371_v3 = vadd.f32 %v370_v59, %v369_v53  ;;  %v1612_v52 = vld [vmem:[#allocation2 + $0xb8] sm:$0xff]   ;;  %v1613_v53 = vld [vmem:[#allocation2 + $0x70] sm:$0xff]   ;;  %v1619_v59 = vld [vmem:[#allocation2 + $0x60] sm:$0xff]  }
 0x163   :  { %1494 = vmatprep.subr.bf16.mxu0 %v1612_v52 }
 0x164   :  { %v362_v57 = vadd.f32 %v361_v54, %v360_v51  ;;  %v375_v58 = vrot.slane %v374_v55, 2  ;;  %v1611_v51 = vld [vmem:[#allocation2 + $0x38] sm:$0xff]   ;;  %1495 = vmatpush3.bf16.msra.mxu0 %v1612_v52  ;;  %v1614_v54 = vld [vmem:[#allocation2 + $0x30] sm:$0xff]  }
 0x166   :  { %v363_v60 = vrot.slane %v362_v57, 1  ;;  %v376_v61 = vadd.f32 %v375_v58, %v374_v55  ;;  %v1615_v55 = vld [vmem:[#allocation2 + $0xb0] sm:$0xff]   ;;  %v1618_v58 = vld [vmem:[#allocation2 + $0xa8] sm:$0xff]  }
 0x167   :  { %1496 = vmatprep.subr.bf16.mxu0 %v1615_v55 }
 0x168   :  { %v364_v63 = vadd.f32 %v363_v60, %v362_v57  ;;  %v377_v2 = vrot.slane %v376_v61, 1  ;;  %1497 = vmatpush3.bf16.msra.mxu0 %v1615_v55  ;;  %v1617_v57 = vld [vmem:[#allocation2 + $0x28] sm:$0xff]   ;;  %v1620_v60 = vld [vmem:[#allocation2 + $0x20] sm:$0xff]  }
 0x169   :  { %1498 = vmatprep.subr.bf16.mxu0 %v1618_v58 }
 0x16a   :  { %v378_v19 = vadd.f32 %v377_v2, %v376_v61  ;;  %v384_v23 = vsel %vm383_vm4, %v364_v63, %v357_v62  ;;  %v1621_v61 = vld [vmem:[#allocation2 + $0xa0] sm:$0xff]   ;;  %v1622_v62 = vld [vmem:[#allocation2 + $0x58] sm:$0xff]  }
 0x16b   :  { %v386_v24 = vsel %vm385_vm5, %v371_v3, %v384_v23  ;;  %v1624_v63 = vld [vmem:[#allocation2 + $0x98] sm:$0xff]   ;;  %v1625_v3 = vld [vmem:[#allocation2 + $0x50] sm:$0xff]  }
 0x16c   :  { %v388_v27 = vsel %vm387_vm6, %v378_v19, %v386_v24  ;;  %1499 = vmatpush3.bf16.msra.mxu0 %v1618_v58  ;;  %v1623_v2 = vld [vmem:[#allocation2 + $0x18] sm:$0xff]   ;;  %v1627_v19 = vld [vmem:[#allocation2 + $0x90] sm:$0xff]   ;;  %v1628_v24 = vld [vmem:[#allocation2 + $0x48] sm:$0xff]  }
 0x16d   :  { %1487 = vmatmul.mubr.f32.vlgmr.msra.gmra.mxu1 %v388_v27  ;;  %1500 = vmatprep.subr.bf16.mxu0 %v1621_v61  ;;  %v1626_v23 = vld [vmem:[#allocation2 + $0x10] sm:$0xff]   ;;  %v1630_v27 = vld [vmem:[#allocation2 + $0x88] sm:$0xff]  }
 0x16e   :  { %1491 = vmatprep.mubr.msk.f32.mxu1 %vm1718_vm3, %v1717_v4  ;;  %1490 = vmatpush3.msra.mxu1 %v2082_v30 }
 0x16f   :  { %1397 = vmatprep.subr.bf16.mxu1 %v1610_v50 }
 0x170   :  { %1501 = vmatpush3.bf16.msra.mxu0 %v1621_v61 }
 0x171   :  { %1502 = vmatprep.subr.bf16.mxu0 %v1624_v63 }
 0x174   :  { %1503 = vmatpush3.bf16.msra.mxu0 %v1624_v63 }
 0x175   :  { %1504 = vmatprep.subr.bf16.mxu0 %v1627_v19 }
 0x178   :  { %1505 = vmatpush3.bf16.msra.mxu0 %v1627_v19 }
 0x179   :  { %1506 = vmatprep.subr.bf16.mxu0 %v1630_v27 }
 0x17c   :  { %1507 = vmatpush3.bf16.msra.mxu0 %v1630_v27 }
 0x22d   :  { %v456_v31 = vpop.f32.mrf.mxu1 }
 0x22e   :  { %v460_v32 = vmul.f32 %v456_v31, %v456_v31 }
 0x22f   :  { %v1488_v33 = vpop.f32.mrf.mxu1 }
 0x230   :  { %v462_v34 = vrot.slane %v460_v32, 6  ;;  %v1631_v32 = vld [vmem:[#allocation2 + $0x40] sm:$0xff]  }
 0x231   :  { %v1632_v33 = vld [vmem:[#allocation2] sm:$0xff]  }
 0x232   :  { %v464_v35 = vsub.f32 %v456_v31, %v462_v34  ;;  %v1633_v34 = vld [vmem:[#allocation2 + $0x80] sm:$0xff]  }
 0x233   :  { %1508 = vmatprep.subr.bf16.mxu0 %v1633_v34 }
 0x234   :  { %v465_v37 = vmax.f32 %v464_v35, 0.0  ;;  %1509 = vmatpush3.bf16.msra.mxu0 %v1633_v34  ;;  %v1719_v35 = vmov 1966171168  }
 0x235   :  { %1549 = vmatprep.subr.mxu0 %v1717_v4 }
 0x236   :  { %v466_v38 = vadd.f32 1e-05, %v465_v37  ;;  %v567_v37 = vunpack.c.l.s4 %v1719_v35 }
 0x238   :  { %1634 = vrsqrt.f32 %v466_v38  ;;  %v568_v38 = vunpack.c.0.s8 %v567_v37 }
 0x245   :  { %v1635_v41 = vpop.eup %1634 }
 0x246   :  { %v474_v43 = vmul.f32 %v1635_v41, %v1325_v40  ;;  %v2096_v40 = vsub.s32 %v568_v38, %v2036_v20 }
 0x248   :  { %v476_v44 = vrot.slane %v474_v43, 2 }
 0x24a   :  { %v478_v46 = vmul.f32 %v476_v44, %v456_v31  ;;  %v1629_v31 = vld [vmem:[#allocation2 + $0x8] sm:$0xff]  }
 0x24c   :  { %v485_v47 = vsub.f32 %v1326_v45, %v478_v46 }
 0x24e   :  { %v487_v48 = vrot.slane %v485_v47, 6 }
 0x250   :  { %v490_v49 = vsel %vm489_vm7, %v476_v44, %v487_v48 }
 0x251   :  { %1492 = vmatmul.mubr.msk.f32.vlgmr.msra.gmra.mxu1 %vm491_vm8, %v490_v49 }
 0x252   :  { %1398 = vmatpush3.bf16.msra.mxu1 %v1611_v51 }
 0x253   :  { %1399 = vmatprep.subr.bf16.mxu1 %v1613_v53 }
 0x256   :  { %1400 = vmatpush3.bf16.msra.mxu1 %v1614_v54 }
 0x257   :  { %1401 = vmatprep.subr.bf16.mxu1 %v1616_v56 }
 0x25a   :  { %1402 = vmatpush3.bf16.msra.mxu1 %v1617_v57 }
 0x25b   :  { %1403 = vmatprep.subr.bf16.mxu1 %v1619_v59 }
 0x25e   :  { %1404 = vmatpush3.bf16.msra.mxu1 %v1620_v60 }
 0x25f   :  { %1405 = vmatprep.subr.bf16.mxu1 %v1622_v62 }
 0x262   :  { %1406 = vmatpush3.bf16.msra.mxu1 %v1623_v2 }
 0x263   :  { %1407 = vmatprep.subr.bf16.mxu1 %v1625_v3 }
 0x266   :  { %1408 = vmatpush3.bf16.msra.mxu1 %v1626_v23 }
 0x267   :  { %1409 = vmatprep.subr.bf16.mxu1 %v1628_v24 }
 0x26a   :  { %1410 = vmatpush3.bf16.msra.mxu1 %v1629_v31 }
 0x26b   :  { %1411 = vmatprep.subr.bf16.mxu1 %v1631_v32 }
 0x26e   :  { %1412 = vmatpush3.bf16.msra.mxu1 %v1632_v33 }
 0x26f   :  { %1514 = vmatprep.subr.mxu1 %v1717_v4 }
 0x311   :  { %v561_v41 = vpop.f32.mrf.mxu1 }
 0x312   :  { %v572_v43 = vrot.slane %v561_v41, %v2096_v40 }
 0x313   :  { %v1493_v44 = vpop.f32.mrf.mxu1 }
 0x314   :  { %v573_v45 = vcombine.high %v572_v43, %v572_v43  ;;  %v580_v46 = vrot.slane %v572_v43, %v2096_v40 }
 0x316   :  { %v587_v47 = vrot.slane %v573_v45, %v2096_v40  ;;  %v588_v48 = vcombine.high %v580_v46, %v580_v46  ;;  %v593_v49 = vrot.slane %v580_v46, %v2039_v21 }
 0x318   :  { %v589_v50 = vcombine.high %v587_v47, %v587_v47  ;;  %v597_v51 = vrot.slane %v587_v47, %v2039_v21  ;;  %v600_v52 = vmul.f32 %v593_v49, %v2050_v26  ;;  %v601_v53 = vmul.f32 %v593_v49, %v2052_v28 }
 0x319   :  { %v607_v54 = vrot.slane %v588_v48, %v2039_v21 }
 0x31a   :  { %v602_v55 = vmul.f32 %v597_v51, %v2064_v39  ;;  %v603_v56 = vmul.f32 %v597_v51, %v2066_v42  ;;  %v611_v57 = vrot.slane %v589_v50, %v2039_v21 }
 0x31b   :  { %v614_v58 = vadd.f32 %v607_v54, %v600_v52  ;;  %v615_v59 = vadd.f32 %v607_v54, %v601_v53 }
 0x31c   :  { %v616_v60 = vadd.f32 %v611_v57, %v602_v55  ;;  %v617_v61 = vadd.f32 %v611_v57, %v603_v56 }
 0x31d   :  { %v1328_v62 = vmul.f32 -1.442695, %v614_v58  ;;  %v1329_v63 = vmul.f32 -1.442695, %v615_v59 }
 0x31e   :  { %v1330_v2 = vmul.f32 -1.442695, %v616_v60  ;;  %v1331_v3 = vmul.f32 -1.442695, %v617_v61 }
 0x31f   :  { %1636 = vpow2.f32 %v1328_v62 }
 0x320   :  { %1638 = vpow2.f32 %v1329_v63 }
 0x321   :  { %1640 = vpow2.f32 %v1330_v2 }
 0x322   :  { %1642 = vpow2.f32 %v1331_v3 }
 0x32c   :  { %v1637_v26 = vpop.eup %1636 }
 0x32d   :  { %v1639_v28 = vpop.eup %1638  ;;  %v630_v19 = vadd.f32 1.0, %v1637_v26 }
 0x32e   :  { %v1641_v39 = vpop.eup %1640  ;;  %v631_v23 = vadd.f32 1.0, %v1639_v28 }
 0x32f   :  { %v1643_v42 = vpop.eup %1642  ;;  %1644 = vrcp.f32 %v630_v19  ;;  %v632_v24 = vadd.f32 1.0, %v1641_v39 }
 0x330   :  { %1646 = vrcp.f32 %v631_v23  ;;  %v633_v27 = vadd.f32 1.0, %v1643_v42 }
 0x331   :  { %1648 = vrcp.f32 %v632_v24 }
 0x332   :  { %1650 = vrcp.f32 %v633_v27 }
 0x33c   :  { %v1645_v31 = vpop.eup %1644 }
 0x33d   :  { %v1647_v32 = vpop.eup %1646  ;;  %v642_v33 = vmul.f32 %v1645_v31, %v614_v58 }
 0x33e   :  { %v1649_v34 = vpop.eup %1648  ;;  %v643_v35 = vmul.f32 %v1647_v32, %v615_v59 }
 0x33f   :  { %v1651_v37 = vpop.eup %1650  ;;  %v651_v38 = vrot.slane %v642_v33, 7  ;;  %v663_v41 = vrot.slane %v642_v33, 1  ;;  %v644_v43 = vmul.f32 %v1649_v34, %v616_v60 }
 0x340   :  { %v652_v44 = vrot.slane %v643_v35, 7  ;;  %v676_v45 = vpack.c.bf16 %v643_v35, %v642_v33  ;;  %v664_v46 = vrot.slane %v643_v35, 1  ;;  %v645_v47 = vmul.f32 %v1651_v37, %v617_v61 }
 0x341   :  { %v666_v49 = vrot.slane %v644_v43, 1  ;;  %v654_v57 = vrot.slane %v644_v43, 7 }
 0x342   :  { %912 = vmatprep.mubr.bf16.mxu1 %v676_v45  ;;  %v653_v50 = vsel %vm650_vm9, %v651_v38, %v652_v44  ;;  %v665_v51 = vsel %vm66_vm0, %v663_v41, %v664_v46  ;;  %v667_v52 = vrot.slane %v645_v47, 1  ;;  %v679_v56 = vpack.c.bf16 %v645_v47, %v644_v43 }
 0x343   :  { %v1359_v53 = vpack.c.bf16 %v653_v50, %v651_v38  ;;  %v1366_v54 = vpack.c.bf16 %v664_v46, %v665_v51  ;;  %v655_v58 = vrot.slane %v645_v47, 7 }
 0x344   :  { %v668_v55 = vsel %vm66_vm0, %v666_v49, %v667_v52 }
 0x345   :  { %1360 = vmatmul.mubr.msk.bf16.vlgmr.msra.gmra.mxu1 %vm2110_vm12, %v1359_v53  ;;  %1510 = vmatprep.mubr.msk.bf16.mxu0 %vm1365_vm13, %v1366_v54  ;;  %v1369_v59 = vpack.c.bf16 %v667_v52, %v668_v55  ;;  %v656_v60 = vsel %vm650_vm9, %v654_v57, %v655_v58 }
 0x346   :  { %920 = vmatprep.mubr.bf16.mxu1 %v679_v56  ;;  %1515 = vmatpush3.msra.mxu1 %v1925_v0  ;;  %v1363_v61 = vpack.c.bf16 %v656_v60, %v654_v57  ;;  %v2159_v0 = vpop.f32.mrf.mxu0 }
 0x347   :  { %1511 = vmatmul.mubr.msk.bf16.vlgmr.msra.gmra.mxu0 %vm1365_vm13, %v1369_v59  ;;  %1516 = vmatprep.subr.mxu1 %v1717_v4 }
 0x348   :  { %1517 = vmatpush3.msra.mxu1 %v1932_v1  ;;  %1550 = vmatpush3.msra.mxu0 %v2082_v30 }
 0x349   :  { %1518 = vmatprep.subr.mxu1 %v1717_v4  ;;  %1551 = vmatprep.mubr.msk.f32.mxu0 %vm1718_vm3, %v1717_v4 }
 0x34a   :  { %1519 = vmatpush3.msra.mxu1 %v1939_v5 }
 0x34b   :  { %1520 = vmatprep.subr.mxu1 %v1717_v4 }
 0x34c   :  { %1521 = vmatpush3.msra.mxu1 %v1946_v6 }
 0x34d   :  { %1364 = vmatmul.mubr.msk.bf16.gmra.mxu1 %vm2110_vm12, %v1363_v61  ;;  %1522 = vmatprep.subr.mxu1 %v1717_v4 }
 0x34e   :  { %1523 = vmatpush3.msra.mxu1 %v1953_v7  ;;  %1546 = vmatprep.mubr.msk.f32.mxu1 %vm1718_vm3, %v1717_v4  ;;  %v1332_v7 = vld [vmem:[%s2213_s4] ss:$0 sm:$0xff] }
 0x34f   :  { %1524 = vmatprep.subr.mxu1 %v1717_v4 }
 0x350   :  { %1525 = vmatpush3.msra.mxu1 %v1960_v8 }
 0x351   :  { %1526 = vmatprep.subr.mxu1 %v1717_v4 }
 0x352   :  { %1527 = vmatpush3.msra.mxu1 %v1967_v9 }
 0x353   :  { %1528 = vmatprep.subr.mxu1 %v1717_v4 }
 0x354   :  { %1529 = vmatpush3.msra.mxu1 %v1974_v10 }
 0x355   :  { %1530 = vmatprep.subr.mxu1 %v1717_v4 }
 0x356   :  { %1531 = vmatpush3.msra.mxu1 %v1981_v11 }
 0x357   :  { %1532 = vmatprep.subr.mxu1 %v1717_v4 }
 0x358   :  { %1533 = vmatpush3.msra.mxu1 %v1988_v12 }
 0x359   :  { %1534 = vmatprep.subr.mxu1 %v1717_v4 }
 0x35a   :  { %1535 = vmatpush3.msra.mxu1 %v1995_v13 }
 0x35b   :  { %1536 = vmatprep.subr.mxu1 %v1717_v4 }
 0x35c   :  { %1537 = vmatpush3.msra.mxu1 %v2002_v14 }
 0x35d   :  { %1538 = vmatprep.subr.mxu1 %v1717_v4 }
 0x35e   :  { %1539 = vmatpush3.msra.mxu1 %v2009_v15 }
 0x35f   :  { %1540 = vmatprep.subr.mxu1 %v1717_v4 }
 0x360   :  { %1541 = vmatpush3.msra.mxu1 %v2014_v16 }
 0x361   :  { %1542 = vmatprep.subr.mxu1 %v1717_v4 }
 0x362   :  { %1543 = vmatpush3.msra.mxu1 %v2023_v17 }
 0x363   :  { %1544 = vmatprep.subr.mxu1 %v1717_v4 }
 0x364   :  { %1545 = vmatpush3.msra.mxu1 %v2030_v18 }
 0x405   :  { %v1413_v1 = vpop.f32.mrf.mxu1 }
 0x407   :  { %v1414_v5 = vpop.f32.mrf.mxu1  ;;  %v1512_v6 = vpop.f32.mrf.mxu0 }
 0x408   :  { %v1415_v8 = vadd.f32 %v1414_v5, %v1413_v1 }
 0x409   :  { %v1416_v9 = vpop.f32.mrf.mxu1  ;;  %v963_v10 = vpop.f32.mrf.mxu0 }
 0x40a   :  { %v915_v11 = vadd.f32 %v1415_v8, %v1332_v7 }
 0x40b   :  { %v1417_v12 = vpop.f32.mrf.mxu1  ;;  %v1513_v13 = vpop.f32.mrf.mxu0 }
 0x40c   :  { %v1418_v14 = vadd.f32 %v1417_v12, %v1416_v9  ;;  %v2164_v4 = vadd.f32 %v963_v10, %v915_v11 }
 0x40d   :  { %v1419_v15 = vpop.f32.mrf.mxu1  ;;  %v966_v17 = vpop.f32.mrf.mxu0 }
 0x40e   :  { %v918_v16 = vadd.f32 %v1418_v14, %v1332_v7  ;;  %v980_v2 = vmul.f32 %v2164_v4, %v2164_v4 }
 0x40f   :  { %v1420_v18 = vpop.f32.mrf.mxu1 }
 0x410   :  { %v2166_v30 = vadd.f32 %v966_v17, %v918_v16  ;;  %v1421_v62 = vadd.f32 %v1420_v18, %v1419_v15  ;;  %v1371_v15 = vld [vmem:[%s2216_s7] ss:$0 sm:$0xff]  ;;  %s1721_s7 = smov [#allocation5]  }
 0x411   :  { %v1422_v63 = vpop.f32.mrf.mxu1 }
 0x412   :  { %v981_v3 = vmul.f32 %v2166_v30, %v2166_v30  ;;  %v984_v26 = vadd.f32 %v2166_v30, %v2164_v4  ;;  %v923_v28 = vadd.f32 %v1421_v62, %v1332_v7  ;;  %v1372_v62 = vld [vmem:[%s2217_s8] ss:$0 sm:$0xff]  ;;  %s1287_s8 = sshll.u32 %s1721_s7, 4  ;;  %s1288_s8 = int_to_ptr.vmem [resolvable:$true] %s1287_s8 }
 0x413   :  { %v1423_v19 = vpop.f32.mrf.mxu1  ;;  %s1690_s0 = scalar_lea.vmem %s1288_s8, 512  ;;  %p1695_p6 = scmp.lt.s32.totalorder %s1288_s8, %s1288_s8 }
 0x414   :  { %v985_v39 = vrot.slane %v984_v26, 4  ;;  %v998_v23 = vadd.f32 %v981_v3, %v980_v2  ;;  %v1424_v42 = vadd.f32 %v1423_v19, %v1422_v63  ;;  %v2174_v31 = vadd.f32 %v1512_v6, %v923_v28  ;;  %p1691_p5 = scmp.ne.s32.totalorder %s1288_s8, %s1690_s0  ;;  %p1696_p7 = scmp.lt.s32.totalorder %s1690_s0, %s1690_s0 }
 0x416   :  { %v986_v24 = vadd.f32 %v985_v39, %v984_v26  ;;  %v999_v27 = vrot.slane %v998_v23, 4  ;;  %v926_v32 = vadd.f32 %v1424_v42, %v1332_v7  ;;  %v982_v37 = vmul.f32 %v2174_v31, %v2174_v31  ;;  %p1697_p8 = por %p1696_p7, %p1695_p6 }
 0x418   :  { %v1000_v33 = vadd.f32 %v999_v27, %v998_v23  ;;  %v975_v34 = vadd.f32 %v1513_v13, %v926_v32  ;;  %v987_v35 = vrot.slane %v986_v24, 2  ;;  %p1698_p9 = pnand %p1697_p8, %p1691_p5 }
 0x41a   :  { %v983_v38 = vmul.f32 %v975_v34, %v975_v34  ;;  %v991_v41 = vadd.f32 %v975_v34, %v2174_v31  ;;  %v1001_v43 = vrot.slane %v1000_v33, 2  ;;  %v988_v46 = vadd.f32 %v987_v35, %v986_v24 }
 0x41c   :  { %v992_v44 = vrot.slane %v991_v41, 4  ;;  %v1005_v45 = vadd.f32 %v983_v38, %v982_v37  ;;  %v1002_v49 = vadd.f32 %v1001_v43, %v1000_v33  ;;  %v989_v52 = vrot.slane %v988_v46, 1 }
 0x41e   :  { %v993_v47 = vadd.f32 %v992_v44, %v991_v41  ;;  %v1006_v48 = vrot.slane %v1005_v45, 4  ;;  %v1003_v55 = vrot.slane %v1002_v49, 1  ;;  %v990_v58 = vadd.f32 %v989_v52, %v988_v46 }
 0x420   :  { %v994_v50 = vrot.slane %v993_v47, 2  ;;  %v1007_v51 = vadd.f32 %v1006_v48, %v1005_v45  ;;  %v1004_v61 = vadd.f32 %v1003_v55, %v1002_v49 }
 0x422   :  { %v995_v53 = vadd.f32 %v994_v50, %v993_v47  ;;  %v1008_v54 = vrot.slane %v1007_v51, 2 }
 0x424   :  { %v996_v56 = vrot.slane %v995_v53, 1  ;;  %v1009_v57 = vadd.f32 %v1008_v54, %v1007_v51 }
 0x426   :  { %v997_v59 = vadd.f32 %v996_v56, %v995_v53  ;;  %v1010_v60 = vrot.slane %v1009_v57, 1  ;;  %v145_v56 = vsub.s32 1, %v2036_v20 }
 0x428   :  { %v1011_v1 = vadd.f32 %v1010_v60, %v1009_v57  ;;  %v1016_v5 = vsel %vm383_vm4, %v997_v59, %v990_v58  ;;  %v146_v57 = vrot.slane %v2044_v22, %v145_v56 }
 0x429   :  { %v1017_v6 = vsel %vm385_vm5, %v1004_v61, %v1016_v5 }
 0x42a   :  { %v1018_v7 = vsel %vm387_vm6, %v1011_v1, %v1017_v6  ;;  %v312_v60 = vadd.f32 %v2048_v25, %v146_v57  ;;  %v316_v5 = vadd.f32 %v2054_v29, %v146_v57  ;;  %v326_v20 = vadd.f32 %v2159_v0, %v146_v57 }
 0x42b   :  { %1547 = vmatmul.mubr.f32.vlgmr.msra.gmra.mxu1 %v1018_v7 }
 0x4eb   :  { %v1086_v8 = vpop.f32.mrf.mxu1 }
 0x4ec   :  { %v1090_v9 = vmul.f32 %v1086_v8, %v1086_v8 }
 0x4ed   :  { %v1548_v10 = vpop.f32.mrf.mxu1 }
 0x4ee   :  { %v1092_v11 = vrot.slane %v1090_v9, 6 }
 0x4f0   :  { %v1094_v12 = vsub.f32 %v1086_v8, %v1092_v11 }
 0x4f2   :  { %v1095_v13 = vmax.f32 %v1094_v12, 0.0 }
 0x4f4   :  { %v1096_v14 = vadd.f32 1e-05, %v1095_v13 }
 0x4f6   :  { %1652 = vrsqrt.f32 %v1096_v14 }
 0x503   :  { %v1653_v16 = vpop.eup %1652 }
 0x504   :  { %v1104_v17 = vmul.f32 %v1653_v16, %v1371_v15 }
 0x506   :  { %v1106_v18 = vrot.slane %v1104_v17, 2 }
 0x508   :  { %v1108_v63 = vmul.f32 %v1106_v18, %v1086_v8  ;;  %v322_v8 = vadd.f32 %v2062_v36, %v146_v57 }
 0x50a   :  { %v1115_v2 = vsub.f32 %v1372_v62, %v1108_v63 }
 0x50c   :  { %v1117_v3 = vrot.slane %v1115_v2, 6 }
 0x50e   :  { %v1119_v26 = vsel %vm489_vm7, %v1106_v18, %v1117_v3 }
 0x50f   :  { %1552 = vmatmul.mubr.msk.f32.vlgmr.msra.gmra.mxu0 %vm491_vm8, %v1119_v26 }
 0x5cf   :  { %v1189_v28 = vpop.f32.mrf.mxu0 }
 0x5d0   :  { %v1200_v19 = vrot.slane %v1189_v28, %v2096_v40 }
 0x5d1   :  { %v1553_v39 = vpop.f32.mrf.mxu0 }
 0x5d2   :  { %v1201_v23 = vcombine.high %v1200_v19, %v1200_v19  ;;  %v1208_v42 = vrot.slane %v1200_v19, %v2096_v40 }
 0x5d4   :  { %v1215_v24 = vrot.slane %v1201_v23, %v2096_v40  ;;  %v1216_v27 = vcombine.high %v1208_v42, %v1208_v42  ;;  %v1221_v32 = vrot.slane %v1208_v42, %v2039_v21 }
 0x5d6   :  { %v1217_v33 = vcombine.high %v1215_v24, %v1215_v24  ;;  %v1225_v35 = vrot.slane %v1215_v24, %v2039_v21  ;;  %v1228_v37 = vmul.f32 %v1221_v32, %v2164_v4  ;;  %v1229_v38 = vmul.f32 %v1221_v32, %v2166_v30 }
 0x5d7   :  { %v1235_v41 = vrot.slane %v1216_v27, %v2039_v21 }
 0x5d8   :  { %v1230_v43 = vmul.f32 %v1225_v35, %v2174_v31  ;;  %v1231_v44 = vmul.f32 %v1225_v35, %v975_v34  ;;  %v1239_v45 = vrot.slane %v1217_v33, %v2039_v21 }
 0x5d9   :  { %v1242_v46 = vadd.f32 %v1235_v41, %v1228_v37  ;;  %v1243_v47 = vadd.f32 %v1235_v41, %v1229_v38 }
 0x5da   :  { %v1244_v40 = vadd.f32 %v1239_v45, %v1230_v43  ;;  %v1245_v48 = vadd.f32 %v1239_v45, %v1231_v44 }
 0x5db   :  { %v1374_v49 = vmul.f32 -1.442695, %v1242_v46  ;;  %v1375_v50 = vmul.f32 -1.442695, %v1243_v47 }
 0x5dc   :  { %v1376_v51 = vmul.f32 -1.442695, %v1244_v40  ;;  %v1377_v52 = vmul.f32 -1.442695, %v1245_v48 }
 0x5dd   :  { %1654 = vpow2.f32 %v1374_v49 }
 0x5de   :  { %1656 = vpow2.f32 %v1375_v50 }
 0x5df   :  { %1658 = vpow2.f32 %v1376_v51 }
 0x5e0   :  { %1660 = vpow2.f32 %v1377_v52 }
 0x5ea   :  { %v1655_v4 = vpop.eup %1654 }
 0x5eb   :  { %v1657_v30 = vpop.eup %1656  ;;  %v1258_v53 = vadd.f32 1.0, %v1655_v4 }
 0x5ec   :  { %v1659_v54 = vpop.eup %1658  ;;  %v1259_v31 = vadd.f32 1.0, %v1657_v30 }
 0x5ed   :  { %v1661_v34 = vpop.eup %1660  ;;  %v1260_v55 = vadd.f32 1.0, %v1659_v54  ;;  %1662 = vrcp.f32 %v1258_v53 }
 0x5ee   :  { %v1261_v21 = vadd.f32 1.0, %v1661_v34  ;;  %1664 = vrcp.f32 %v1259_v31 }
 0x5ef   :  { %1666 = vrcp.f32 %v1260_v55 }
 0x5f0   :  { %1668 = vrcp.f32 %v1261_v21 }
 0x5fa   :  { %v1663_v58 = vpop.eup %1662 }
 0x5fb   :  { %v1665_v59 = vpop.eup %1664  ;;  %v1270_v61 = vmul.f32 %v1663_v58, %v1242_v46 }
 0x5fc   :  { %v1667_v1 = vpop.eup %1666  ;;  %v1271_v6 = vmul.f32 %v1665_v59, %v1243_v47 }
 0x5fd   :  { %v1669_v7 = vpop.eup %1668  ;;  %v1272_v9 = vmul.f32 %v1667_v1, %v1244_v40  ;;  %v1274_v10 = vadd.f32 %v1270_v61, %v312_v60 }
 0x5fe   :  { %v1273_v11 = vmul.f32 %v1669_v7, %v1245_v48  ;;  %v1275_v22 = vadd.f32 %v1271_v6, %v316_v5 }
 0x5ff   :  { %v1276_v12 = vadd.f32 %v1272_v9, %v322_v8  ;;  %1278 = vst [vmem:[#allocation5] sm:$0xff] %v1274_v10 }
 0x600   :  { %v1277_v25 = vadd.f32 %v1273_v11, %v326_v20  ;;  %1279 = vst [vmem:[#allocation5 + $0x8] sm:$0xff] %v1275_v22 }
 0x601   :  { %1280 = vst [vmem:[#allocation5 + $0x10] sm:$0xff] %v1276_v12 }
 0x602   :  { %1281 = vst [vmem:[#allocation5 + $0x18] sm:$0xff] %v1277_v25 }
 0x603   :  { %1701 = shalt.err (!%p1698_p9)
}
 0x604   :  { %s1722_s18 = smov 128   ;;  %s1723_s19 = smov 8  }
 0x605   :  { %1293 = dma.vmem_to_hbm [thread:$0]  %s1288_s8, 512, %s2220_s11, [#allocation4], %s1722_s18, %s1722_s18, %s1723_s19  }
 0x606   :  { %1712 = dma.done.wait [#allocation4], 512  }
 0x607   :  { %1713 = vsyncadd [#allocation4], 4294966784 }
 0x608   :  { %1297 = vsyncpa [#allocation3], 1 }
 0x609   :  { %1298 = vsyncpa [#allocation4], 1 }

</bundles_post_ra>
